<compile_context>
chip_gen: v6e
topology: v6e:2x2x1
jax: 0.10.0
libtpu: 0.0.40
codegen_flags: <defaults>
</compile_context>

<pallas_src>
import functools

import jax
import jax.numpy as jnp
from jax.experimental import pallas as pl
from jax.experimental.pallas import tpu as pltpu

GAMMA = 2.0
LANES = 128
SUBLANES = 8


def _pow_int(u, n):
    """u**n for non-negative integer n via multiply chain (VPU, not EUP)."""
    result = None
    base = u
    while n > 0:
        if n & 1:
            result = base if result is None else result * base
        n >>= 1
        if n:
            base = base * base
    return result if result is not None else jnp.ones_like(u)


def _max_tile_rows(itemsize):
    """Rows per block.  ~2 MiB/block (=> 8 MiB double-buffered for 2 inputs)
    fits the default scoped-VMEM limit on every generation (16 MiB on v5e).
    v7x has only 64 MiB physical VMEM but 3.2 TB/s HBM, so there we double the
    block so per-step DMA time stays well above the fixed per-step overhead."""
    block_bytes = 2 << 20
    try:
        info = pltpu.get_tpu_info()
        if getattr(info, "vmem_capacity_bytes", 128 << 20) <= (64 << 20):
            block_bytes = 4 << 20
    except Exception:
        pass  # not on a TPU / API mismatch: keep the safe default
    rows = block_bytes // (LANES * itemsize)
    return max(512, (rows // 32) * 32)  # multiple of 32: OK for f32/bf16/int8


def _focal_loss_kernel(x_ref, t_ref, o_ref, acc_ref, *, gamma, total_elems,
                       need_mask, binary_targets):
    step = pl.program_id(1)
    tile_rows = x_ref.shape[0]

    @pl.when(step == 0)
    def _():
        acc_ref[...] = jnp.zeros_like(acc_ref)

    x = x_ref[...].astype(jnp.float32)
    t = t_ref[...].astype(jnp.float32)

    # Numerically stable BCE-with-logits (matches PyTorch):
    #   bce = max(x, 0) - x*t + log1p(exp(-|x|))
    e = jnp.exp(-jnp.abs(x))
    bce = jnp.maximum(x, 0.0) - x * t + jnp.log1p(e)

    if binary_targets:
        # pt = exp(-bce) rewritten to reuse e (valid only for t in {0, 1});
        # drops one full-precision EUP transcendental per element.
        num = jnp.where(jnp.logical_xor(x >= 0.0, t >= 0.5), e, 1.0)
        pt = num * pl.reciprocal(1.0 + e, approx=True)
    else:
        pt = jnp.exp(-bce)

    u = 1.0 - pt
    if float(gamma).is_integer() and 0 <= gamma <= 16:
        mod = _pow_int(u, int(gamma))                     # plain VPU multiplies
    else:
        mod = jnp.maximum(u, 0.0) ** jnp.float32(gamma)   # general (EUP) fallback
    focal = mod * bce

    if need_mask:
        # Zero out everything past the true element count: ragged last block,
        # sub-128 pad tail and megacore overflow block all land here.  The
        # masked-off values may be garbage; jnp.where selects, so that's safe.
        blk = pl.program_id(0) * pl.num_programs(1) + step
        row = jax.lax.broadcasted_iota(jnp.int32, focal.shape, 0)
        col = jax.lax.broadcasted_iota(jnp.int32, focal.shape, 1)
        flat = (blk * tile_rows + row) * LANES + col
        focal = jnp.where(flat < total_elems, focal, 0.0)

    # Vreg-shaped accumulator: the reshape is vreg-tile aligned (no relayout)
    # and the axis-0 sum is pure VPU adds; no per-step cross-lane reduce.
    full_rows = (tile_rows // SUBLANES) * SUBLANES
    if full_rows:
        acc_ref[...] += focal[:full_rows].reshape(
            full_rows // SUBLANES, SUBLANES, LANES).sum(axis=0)
    rem = tile_rows - full_rows
    if rem:  # tiny inputs (rows not a multiple of 8) -> one masked partial add
        acc_ref[0:rem, :] += focal[full_rows:, :]

    @pl.when(step == pl.num_programs(1) - 1)
    def _():
        # Per-core (8, 128) partial block; final reduction + mean in wrapper.
        o_ref[0] = acc_ref[...]


def focal_loss(logits, targets, gamma=GAMMA, binary_targets=False):
    assert logits.shape == targets.shape
    # gamma is baked into the kernel: it must be a static Python number.
    gamma = float(gamma)
    total_elems = logits.size

    x = logits.reshape(-1)   # keep original dtype; cast to f32 in-kernel
    t = targets.reshape(-1)

    rows = pl.cdiv(total_elems, LANES)
    if rows * LANES != total_elems:
        # TODO(synk): a fully zero-copy path for sizes that are not multiples
        # of 128 would need a 1-D blocked layout; this pad (values are
        # irrelevant, they are masked in-kernel) still copies the inputs.
        pad = rows * LANES - total_elems
        x = jnp.pad(x, (0, pad))
        t = jnp.pad(t, (0, pad))
    x2d = x.reshape(rows, LANES)
    t2d = t.reshape(rows, LANES)

    itemsize = max(jnp.dtype(logits.dtype).itemsize,
                   jnp.dtype(targets.dtype).itemsize)
    max_rows = _max_tile_rows(itemsize)
    tile_rows = rows if rows <= max_rows else max_rows
    num_blocks = pl.cdiv(rows, tile_rows)

    # Megacore split of the block range across TensorCores ("parallel" axis);
    # per-core partial sums are combined below.  1-TC chips run it serially.
    num_cores = 2 if num_blocks >= 2 else 1
    steps = pl.cdiv(num_blocks, num_cores)

    covered_rows = num_cores * steps * tile_rows
    need_mask = covered_rows * LANES != total_elems

    if num_cores * steps == num_blocks:
        def index_map(c, i):
            return (c * steps + i, 0)
    else:
        # Odd block count: core 1's overflow step re-reads the last in-bounds
        # block; its contribution is zeroed by the in-kernel mask.
        def index_map(c, i):
            return (jnp.minimum(c * steps + i, num_blocks - 1), 0)

    kernel = functools.partial(
        _focal_loss_kernel,
        gamma=gamma,
        total_elems=total_elems,
        need_mask=need_mask,
        binary_targets=binary_targets,
    )

    partials = pl.pallas_call(
        kernel,
        out_shape=jax.ShapeDtypeStruct((num_cores, SUBLANES, LANES), jnp.float32),
        grid_spec=pltpu.PrefetchScalarGridSpec(
            num_scalar_prefetch=0,
            grid=(num_cores, steps),
            in_specs=[
                pl.BlockSpec((tile_rows, LANES), index_map),
                pl.BlockSpec((tile_rows, LANES), index_map),
            ],
            out_specs=pl.BlockSpec((1, SUBLANES, LANES), lambda c, i: (c, 0, 0)),
            scratch_shapes=[pltpu.VMEM((SUBLANES, LANES), jnp.float32)],
        ),
        compiler_params=pltpu.CompilerParams(
            dimension_semantics=("parallel", "arbitrary"),
        ),
    )(x2d, t2d)

    return jnp.sum(partials) / jnp.float32(total_elems)


def focal_loss_ref(logits, targets, gamma=GAMMA):
    x = logits.astype(jnp.float32)
    t = targets.astype(jnp.float32)
    bce = jnp.maximum(x, 0.0) - x * t + jnp.log1p(jnp.exp(-jnp.abs(x)))
    pt = jnp.exp(-bce)
    return jnp.mean((1.0 - pt) ** gamma * bce)


if __name__ == "__main__":
    key = jax.random.PRNGKey(0)
    k1, k2 = jax.random.split(key)
    # NCHW, small shapes: batch=2, channels=4, spatial=16x16
    logits = jax.random.normal(k1, (2, 4, 16, 16), dtype=jnp.float32)
    targets = jax.random.bernoulli(k2, p=0.3, shape=(2, 4, 16, 16)).astype(jnp.float32)

    ref = focal_loss_ref(logits, targets)

    loss = focal_loss(logits, targets)
    jax.block_until_ready(loss)
    assert jnp.allclose(loss, ref, rtol=1e-5, atol=1e-6), (loss, ref)

    # Optional fast path for hard {0,1} targets (drops one EUP transcendental,
    # uses an approximate reciprocal -> validated at a looser tolerance).
    loss_bin = focal_loss(logits, targets, binary_targets=True)
    jax.block_until_ready(loss_bin)
    assert jnp.allclose(loss_bin, ref, rtol=1e-3, atol=1e-4), (loss_bin, ref)

    print("KERNEL_OK")
</pallas_src>

<mosaic_0001>
module attributes {stable_mosaic.version = 11 : i64} {
  func.func @_focal_loss_kernel(%arg0: i32, %arg1: i32, %arg2: memref<16x128xf32, #tpu.memory_space<vmem>>, %arg3: memref<16x128xf32, #tpu.memory_space<vmem>>, %arg4: memref<1x8x128xf32, #tpu.memory_space<vmem>>, %arg5: memref<8x128xf32, #tpu.memory_space<vmem>>) attributes {dimension_semantics = [#tpu.dimension_semantics<parallel>, #tpu.dimension_semantics<arbitrary>], iteration_bounds = array<i64: 1, 1>, scalar_prefetch = 0 : i64, scratch_operands = 1 : i64, tpu.core_type = #tpu.core_type<tc>, window_params = [{transform_indices = @transform_0, window_bounds = array<i64: 16, 128>}, {transform_indices = @transform_1, window_bounds = array<i64: 16, 128>}, {transform_indices = @transform_2, window_bounds = array<i64: 1, 8, 128>}]} {
    %c0_i32 = arith.constant 0 : i32
    %0 = arith.cmpi eq, %arg1, %c0_i32 : i32
    %1 = arith.extui %0 : i1 to i32
    %c0_i32_0 = arith.constant 0 : i32
    %2 = arith.cmpi ne, %1, %c0_i32_0 : i32
    scf.if %2 {
      %cst_14 = arith.constant 0.000000e+00 : f32
      %30 = vector.broadcast %cst_14 : f32 to vector<8x128xf32>
      %c0_15 = arith.constant 0 : index
      %c0_16 = arith.constant 0 : index
      %31 = vector.load %arg5[%c0_15, %c0_16] : memref<8x128xf32, #tpu.memory_space<vmem>>, vector<8x128xf32>
      tpu.vector_store %arg5[%c0_15, %c0_16], %30 {strides = array<i32>} : memref<8x128xf32, #tpu.memory_space<vmem>>, vector<8x128xf32>,
    } else {
    }
    %c0 = arith.constant 0 : index
    %c0_1 = arith.constant 0 : index
    %3 = vector.load %arg2[%c0, %c0_1] : memref<16x128xf32, #tpu.memory_space<vmem>>, vector<16x128xf32>
    %c0_2 = arith.constant 0 : index
    %c0_3 = arith.constant 0 : index
    %4 = vector.load %arg3[%c0_2, %c0_3] : memref<16x128xf32, #tpu.memory_space<vmem>>, vector<16x128xf32>
    %5 = math.absf %3 : vector<16x128xf32>
    %cst = arith.constant 0.000000e+00 : f32
    %6 = vector.broadcast %cst : f32 to vector<16x128xf32>
    %7 = arith.subf %6, %5 : vector<16x128xf32>
    %8 = math.exp %7 : vector<16x128xf32>
    %cst_4 = arith.constant 0.000000e+00 : f32
    %9 = vector.broadcast %cst_4 : f32 to vector<16x128xf32>
    %10 = arith.maximumf %3, %9 : vector<16x128xf32>
    %11 = arith.mulf %3, %4 : vector<16x128xf32>
    %12 = arith.subf %10, %11 : vector<16x128xf32>
    %13 = math.log1p %8 : vector<16x128xf32>
    %14 = arith.addf %12, %13 : vector<16x128xf32>
    %cst_5 = arith.constant 0.000000e+00 : f32
    %15 = vector.broadcast %cst_5 : f32 to vector<16x128xf32>
    %16 = arith.subf %15, %14 : vector<16x128xf32>
    %17 = math.exp %16 : vector<16x128xf32>
    %cst_6 = arith.constant 1.000000e+00 : f32
    %18 = vector.broadcast %cst_6 : f32 to vector<16x128xf32>
    %19 = arith.subf %18, %17 : vector<16x128xf32>
    %20 = arith.mulf %19, %19 : vector<16x128xf32>
    %21 = arith.mulf %20, %14 : vector<16x128xf32>
    %c0_7 = arith.constant 0 : index
    %c0_8 = arith.constant 0 : index
    %22 = vector.load %arg5[%c0_7, %c0_8] : memref<8x128xf32, #tpu.memory_space<vmem>>, vector<8x128xf32>
    %23 = vector.shape_cast %21 : vector<16x128xf32> to vector<2x8x128xf32>
    %cst_9 = arith.constant dense<0.000000e+00> : vector<8x128xf32>
    %24 = vector.multi_reduction <add>, %23, %cst_9 [0] : vector<2x8x128xf32> to vector<8x128xf32>
    %25 = arith.addf %22, %24 : vector<8x128xf32>
    %c0_10 = arith.constant 0 : index
    %c0_11 = arith.constant 0 : index
    %26 = vector.load %arg5[%c0_10, %c0_11] : memref<8x128xf32, #tpu.memory_space<vmem>>, vector<8x128xf32>
    tpu.vector_store %arg5[%c0_10, %c0_11], %25 {strides = array<i32>} : memref<8x128xf32, #tpu.memory_space<vmem>>, vector<8x128xf32>,
    %c0_i32_12 = arith.constant 0 : i32
    %27 = arith.cmpi eq, %arg1, %c0_i32_12 : i32
    %28 = arith.extui %27 : i1 to i32
    %c0_i32_13 = arith.constant 0 : i32
    %29 = arith.cmpi ne, %28, %c0_i32_13 : i32
    scf.if %29 {
      %c0_14 = arith.constant 0 : index
      %c0_15 = arith.constant 0 : index
      %30 = vector.load %arg5[%c0_14, %c0_15] : memref<8x128xf32, #tpu.memory_space<vmem>>, vector<8x128xf32>
      %c0_16 = arith.constant 0 : index
      %c0_17 = arith.constant 0 : index
      %c0_18 = arith.constant 0 : index
      %31 = vector.load %arg4[%c0_16, %c0_17, %c0_18] : memref<1x8x128xf32, #tpu.memory_space<vmem>>, vector<1x8x128xf32>
      %32 = vector.shape_cast %31 : vector<1x8x128xf32> to vector<8x128xf32>
      %33 = vector.shape_cast %30 : vector<8x128xf32> to vector<1x8x128xf32>
      tpu.vector_store %arg4[%c0_16, %c0_17, %c0_18], %33 {strides = array<i32>} : memref<1x8x128xf32, #tpu.memory_space<vmem>>, vector<1x8x128xf32>,
    } else {
    }
    return
  }
  func.func @transform_0(%arg0: i32, %arg1: i32) -> (i32, i32) {
    %c1_i32 = arith.constant 1 : i32
    %0 = arith.muli %arg0, %c1_i32 : i32
    %1 = arith.addi %0, %arg1 : i32
    %c0_i32 = arith.constant 0 : i32
    %c0_i32_0 = arith.constant 0 : i32
    return %1, %c0_i32 : i32, i32
  }
  func.func @transform_1(%arg0: i32, %arg1: i32) -> (i32, i32) {
    %c1_i32 = arith.constant 1 : i32
    %0 = arith.muli %arg0, %c1_i32 : i32
    %1 = arith.addi %0, %arg1 : i32
    %c0_i32 = arith.constant 0 : i32
    %c0_i32_0 = arith.constant 0 : i32
    return %1, %c0_i32 : i32, i32
  }
  func.func @transform_2(%arg0: i32, %arg1: i32) -> (i32, i32, i32) {
    %c0_i32 = arith.constant 0 : i32
    %c0_i32_0 = arith.constant 0 : i32
    %c0_i32_1 = arith.constant 0 : i32
    return %arg0, %c0_i32, %c0_i32_0 : i32, i32, i32
  }
}

</mosaic_0001>

<bundles_post_ra>
// kernel: tpu_custom_call.1
= control target key start
LH: loop header
LB: loop body
LE: loop exit
PB: predicated region body
PF: predicated region fallthrough
CT: control target
= control target key end

     0   :  { %7 = vsyncpa [#allocation4], 0  ;;  %s244_s0 = inlined_call_operand.hbm [shape: f32[16,128], index: 0, kind: input, shape index: {}]   ;;  %s245_s1 = inlined_call_operand.hbm [shape: f32[16,128], index: 1, kind: input, shape index: {}]   ;;  %s246_s2 = inlined_call_operand.hbm [shape: f32[1,8,128], index: 2, kind: output, shape index: {}]  }
   0x1   :  { %8 = vsyncpa [#allocation7], 0 }
   0x2   :  { %9 = vsyncpa [#allocation5], 0  ;;  %s215_s9 = smov [#allocation3]  }
   0x3   :  { %s19_s10 = sshll.u32 %s215_s9, 4  ;;  %s20_s10 = int_to_ptr.vmem [resolvable:$true] %s19_s10 }
   0x4   :  { %s157_s11 = scalar_lea.vmem %s20_s10, 256  ;;  %p162_p1 = scmp.lt.s32.totalorder %s20_s10, %s20_s10 }
   0x5   :  { %p158_p0 = scmp.ne.s32.totalorder %s20_s10, %s157_s11  ;;  %p163_p2 = scmp.lt.s32.totalorder %s157_s11, %s157_s11 }
   0x7   :  { %p164_p3 = por %p163_p2, %p162_p1 }
   0x9   :  { %p165_p4 = pnand %p164_p3, %p158_p0 }
   0xb   :  { %168 = shalt.err (!%p165_p4)
}
   0xc   :  { %s216_s12 = smov 128   ;;  %s217_s13 = smov 8  }
   0xd   :  { %25 = dma.hbm_to_vmem [thread:$0]  %s244_s0, 256, %s20_s10, [#allocation4], %s216_s12, %s216_s12, %s217_s13  }
   0xe   :  { %s218_s16 = smov [#allocation6]  }
   0xf   :  { %s35_s17 = sshll.u32 %s218_s16, 4  ;;  %s36_s17 = int_to_ptr.vmem [resolvable:$true] %s35_s17 }
  0x10   :  { %s177_s18 = scalar_lea.vmem %s36_s17, 256  ;;  %p182_p6 = scmp.lt.s32.totalorder %s36_s17, %s36_s17 }
  0x11   :  { %p178_p5 = scmp.ne.s32.totalorder %s36_s17, %s177_s18  ;;  %p183_p7 = scmp.lt.s32.totalorder %s177_s18, %s177_s18 }
  0x13   :  { %p184_p8 = por %p183_p7, %p182_p6 }
  0x15   :  { %p185_p9 = pnand %p184_p8, %p178_p5 }
  0x17   :  { %188 = shalt.err (!%p185_p9)
}
  0x18   :  { %41 = dma.hbm_to_vmem [thread:$0]  %s245_s1, 256, %s36_s17, [#allocation7], %s216_s12, %s216_s12, %s217_s13  }
  0x19   :  { %209 = dma.done.wait [#allocation4], 256  }
  0x1a   :  { %210 = vsyncadd [#allocation4], 4294967040 }
  0x1b   :  { %211 = dma.done.wait [#allocation7], 256  }
  0x1c   :  { %212 = vsyncadd [#allocation7], 4294967040  ;;  %v57_v0 = vld [vmem:[#allocation3] sm:$0xff]  ;;  %v58_v1 = vld [vmem:[#allocation3 + $0x8] sm:$0xff]  ;;  %s219_s0 = smov [#allocation8]  }
  0x1d   :  { %v61_v2 = vand.u32 2147483647, %v57_v0  ;;  %v62_v3 = vand.u32 2147483647, %v58_v1  ;;  %v59_v14 = vld [vmem:[#allocation6] sm:$0xff]  ;;  %v60_v15 = vld [vmem:[#allocation6 + $0x8] sm:$0xff] }
  0x1e   :  { %v69_v17 = vmax.f32 %v57_v0, 0.0  ;;  %v71_v18 = vmul.f32 %v59_v14, %v57_v0  ;;  %v70_v21 = vmax.f32 %v58_v1, 0.0  ;;  %v72_v22 = vmul.f32 %v60_v15, %v58_v1  ;;  %s122_s1 = sshll.u32 %s219_s0, 4  ;;  %s123_s1 = int_to_ptr.vmem [resolvable:$true] %s122_s1 }
  0x1f   :  { %v63_v4 = vsub.f32 0.0, %v61_v2  ;;  %v64_v5 = vsub.f32 0.0, %v62_v3  ;;  %s189_s21 = scalar_lea.vmem %s123_s1, 128  ;;  %p194_p11 = scmp.lt.s32.totalorder %s123_s1, %s123_s1 }
  0x20   :  { %v73_v26 = vsub.f32 %v69_v17, %v71_v18  ;;  %v74_v29 = vsub.f32 %v70_v21, %v72_v22  ;;  %p190_p10 = scmp.ne.s32.totalorder %s123_s1, %s189_s21  ;;  %p195_p12 = scmp.lt.s32.totalorder %s189_s21, %s189_s21 }
  0x21   :  { %v65_v6 = vmul.f32 1.442695, %v63_v4  ;;  %v67_v7 = vmul.f32 1.442695, %v64_v5 }
  0x22   :  { %p196_p13 = por %p195_p12, %p194_p11 }
  0x23   :  { %137 = vpow2.f32 %v65_v6 }
  0x24   :  { %139 = vpow2.f32 %v67_v7  ;;  %p197_p0 = pnand %p196_p13, %p190_p10 }
  0x30   :  { %v138_v8 = vpop.eup %137 }
  0x31   :  { %v140_v9 = vpop.eup %139  ;;  %v75_v10 = vadd.f32 1.0, %v138_v8  ;;  %v78_v12 = vmul.f32 -0.5, %v138_v8  ;;  %v81_v19 = vand.u32 2147483647, %v138_v8 }
  0x32   :  { %v84_v11 = vadd.f32 1.0, %v140_v9  ;;  %v87_v13 = vmul.f32 -0.5, %v140_v9  ;;  %v90_v23 = vand.u32 2147483647, %v140_v9 }
  0x33   :  { %141 = vlog2.f32 %v75_v10  ;;  %v79_v16 = vadd.f32 1.0, %v78_v12  ;;  %vm82_vm0 = vcmp.lt.f32.partialorder %v81_v19, 0.0004427343 }
  0x34   :  { %143 = vlog2.f32 %v84_v11  ;;  %v88_v20 = vadd.f32 1.0, %v87_v13  ;;  %vm91_vm1 = vcmp.lt.f32.partialorder %v90_v23, 0.0004427343 }
  0x35   :  { %v80_v24 = vmul.f32 %v138_v8, %v79_v16 }
  0x36   :  { %v89_v27 = vmul.f32 %v140_v9, %v88_v20 }
  0x40   :  { %v142_v25 = vpop.eup %141 }
  0x41   :  { %v144_v28 = vpop.eup %143  ;;  %v77_v30 = vmul.f32 0.6931472, %v142_v25 }
  0x42   :  { %v86_v31 = vmul.f32 0.6931472, %v144_v28 }
  0x43   :  { %v83_v32 = vsel %vm82_vm0, %v80_v24, %v77_v30 }
  0x44   :  { %v92_v33 = vsel %vm91_vm1, %v89_v27, %v86_v31  ;;  %v93_v34 = vadd.f32 %v83_v32, %v73_v26 }
  0x45   :  { %v94_v35 = vadd.f32 %v92_v33, %v74_v29 }
  0x46   :  { %v95_v36 = vsub.f32 0.0, %v93_v34 }
  0x47   :  { %v96_v37 = vsub.f32 0.0, %v94_v35 }
  0x48   :  { %v97_v38 = vmul.f32 1.442695, %v95_v36 }
  0x49   :  { %v99_v39 = vmul.f32 1.442695, %v96_v37 }
  0x4a   :  { %145 = vpow2.f32 %v97_v38 }
  0x4b   :  { %147 = vpow2.f32 %v99_v39 }
  0x57   :  { %v146_v40 = vpop.eup %145 }
  0x58   :  { %v148_v41 = vpop.eup %147  ;;  %v101_v42 = vsub.f32 1.0, %v146_v40 }
  0x59   :  { %v102_v43 = vsub.f32 1.0, %v148_v41 }
  0x5a   :  { %v103_v44 = vmul.f32 %v101_v42, %v101_v42 }
  0x5b   :  { %v104_v45 = vmul.f32 %v102_v43, %v102_v43 }
  0x5c   :  { %v105_v46 = vmul.f32 %v103_v44, %v93_v34 }
  0x5d   :  { %v106_v47 = vmul.f32 %v104_v45, %v94_v35 }
  0x5f   :  { %v108_v48 = vadd.f32 %v106_v47, %v105_v46 }
  0x61   :  { %115 = vst [vmem:[#allocation8] sm:$0xff] %v108_v48 }
  0x62   :  { %200 = shalt.err (!%p197_p0)
}
  0x63   :  { %125 = dma.vmem_to_hbm [thread:$0]  %s123_s1, 128, %s246_s2, [#allocation5]  }
  0x64   :  { %213 = dma.done.wait [#allocation5], 128  }
  0x65   :  { %214 = vsyncadd [#allocation5], 4294967168 }
  0x66   :  { %129 = vsyncpa [#allocation4], 1 }
  0x67   :  { %130 = vsyncpa [#allocation7], 1 }
  0x68   :  { %131 = vsyncpa [#allocation5], 1 }

</bundles_post_ra>
